<compile_context>
chip_gen: v7x
topology: tpu7x:2x2x1
jax: 0.10.0
libtpu: 0.0.40
codegen_flags: <defaults>
</compile_context>

<pallas_src>
import functools

import jax
import jax.numpy as jnp
from jax.experimental import pallas as pl
from jax.experimental.pallas import tpu as pltpu


def _round_up(n, m):
    return -(-n // m) * m


def _pad_axis(a, axis, target):
    pad = target - a.shape[axis]
    if pad == 0:
        return a
    widths = [(0, 0)] * a.ndim
    widths[axis] = (0, pad)
    return jnp.pad(a, widths)


def _biaffine_kernel(x_ref, u_ref, yt_ref, o_ref, *, out_size, j_pad):
    # x_ref : (1, Lx_p, I_p)     u_ref : (I_p, O*J_p)
    # yt_ref: (1, J_p, Ly_p)     o_ref : (1, O, Lx_p, Ly_p)
    xb = x_ref[0]                       # [Lx_p, I_p]   (native dtype, no upcast)
    yt = yt_ref[0]                      # [J_p, Ly_p]

    # One fused first matmul per batch: [Lx_p, I_p] @ [I_p, O*J_p].
    t = jnp.dot(xb, u_ref[...], preferred_element_type=jnp.float32)  # [Lx_p, O*J_p] f32

    # Second matmuls: one lane-aligned static slice of t per output channel.
    # (O is small for biaffine heads, so the unrolled loop is cheap.)
    for o in range(out_size):
        t_o = t[:, o * j_pad:(o + 1) * j_pad]                         # [Lx_p, J_p]
        res = jnp.dot(t_o, yt, preferred_element_type=jnp.float32)    # [Lx_p, Ly_p]
        o_ref[0, o] = res.astype(o_ref.dtype)


def biaffine_pallas(x, y, U, bias_x=True, bias_y=True):
    """x: [B, Lx, in_size], y: [B, Ly, in_size], U: [in+bx, out, in+by].

    Returns [B, Lx, Ly, out]  (matches torch.einsum('bxi,ioj,byj->bxyo')).
    """
    if bias_x:
        x = jnp.concatenate([x, jnp.ones_like(x[..., :1])], axis=-1)
    if bias_y:
        y = jnp.concatenate([y, jnp.ones_like(y[..., :1])], axis=-1)

    B, Lx, I = x.shape
    _, Ly, J = y.shape
    assert U.shape[0] == I and U.shape[2] == J
    O = U.shape[1]

    LANE, SUB = 128, 8
    I_p = _round_up(I, LANE)
    J_p = _round_up(J, LANE)
    Lx_p = _round_up(Lx, SUB)
    Ly_p = _round_up(Ly, LANE)

    out_dtype = jnp.result_type(x.dtype, y.dtype, U.dtype)

    # Zero-pad (zeros contribute 0 to the contraction -> result unchanged).
    x_p = _pad_axis(_pad_axis(x, 2, I_p), 1, Lx_p)                 # [B, Lx_p, I_p]
    U_p = _pad_axis(_pad_axis(U, 0, I_p), 2, J_p)                  # [I_p, O, J_p]
    U_flat = U_p.reshape(I_p, O * J_p)                             # free contiguous reshape
    y_p = _pad_axis(_pad_axis(y, 2, J_p), 1, Ly_p)                 # [B, Ly_p, J_p]
    yT = jnp.transpose(y_p, (0, 2, 1))                             # [B, J_p, Ly_p] (one-time)

    # Explicit VMEM budget (double-buffered ins/out + the f32 t intermediate).
    vmem_bytes = (
        2 * Lx_p * I_p * x_p.dtype.itemsize
        + 2 * I_p * O * J_p * U_flat.dtype.itemsize
        + 2 * J_p * Ly_p * yT.dtype.itemsize
        + 2 * O * Lx_p * Ly_p * 4
        + Lx_p * O * J_p * 4
    )
    vmem_limit = int(min(max(vmem_bytes + (4 << 20), 32 << 20), 128 << 20))

    kernel = functools.partial(_biaffine_kernel, out_size=O, j_pad=J_p)

    out = pl.pallas_call(
        kernel,
        out_shape=jax.ShapeDtypeStruct((B, O, Lx_p, Ly_p), jnp.float32),
        grid_spec=pltpu.PrefetchScalarGridSpec(
            num_scalar_prefetch=0,
            grid=(B,),
            in_specs=[
                pl.BlockSpec((1, Lx_p, I_p), lambda b: (b, 0, 0)),
                # Same block every step -> Pallas skips the re-DMA of U.
                pl.BlockSpec((I_p, O * J_p), lambda b: (0, 0)),
                pl.BlockSpec((1, J_p, Ly_p), lambda b: (b, 0, 0)),
            ],
            out_specs=pl.BlockSpec((1, O, Lx_p, Ly_p), lambda b: (b, 0, 0, 0)),
        ),
        compiler_params=pltpu.CompilerParams(
            dimension_semantics=("parallel",),
            vmem_limit_bytes=vmem_limit),
    )(x_p, U_flat, yT)

    out = out[:, :, :Lx, :Ly]                                      # strip padding
    # TODO(synk): downstream consumers could take [B, O, Lx, Ly] directly and
    # skip this extra HBM transpose pass; kept here to match PyTorch layout.
    return jnp.transpose(out, (0, 2, 3, 1)).astype(out_dtype)


if __name__ == "__main__":
    # Small deterministic example consistent with the module's forward.
    batch, seq_x, seq_y, in_size, out_size = 2, 8, 8, 32, 4
    bias_x, bias_y = True, True

    key = jax.random.PRNGKey(0)
    kx, ky, ku = jax.random.split(key, 3)

    x = jax.random.normal(kx, (batch, seq_x, in_size), dtype=jnp.float32)
    y = jax.random.normal(ky, (batch, seq_y, in_size), dtype=jnp.float32)
    # Parameter init mirroring torch.randn(in+bx, out, in+by), deterministic.
    U = jax.random.normal(
        ku, (in_size + int(bias_x), out_size, in_size + int(bias_y)),
        dtype=jnp.float32)

    out = biaffine_pallas(x, y, U, bias_x=bias_x, bias_y=bias_y)
    out = jax.block_until_ready(out)

    # Reference check against plain-JAX einsum (same semantics as PyTorch).
    xb = jnp.concatenate([x, jnp.ones_like(x[..., :1])], axis=-1)
    yb = jnp.concatenate([y, jnp.ones_like(y[..., :1])], axis=-1)
    ref = jnp.einsum('bxi,ioj,byj->bxyo', xb, U, yb)
    assert out.shape == (batch, seq_x, seq_y, out_size)
    assert jnp.allclose(out, ref, atol=1e-4, rtol=1e-4)

    print("KERNEL_OK")
</pallas_src>

<mosaic_0001>
module attributes {stable_mosaic.version = 11 : i64} {
  func.func @_biaffine_kernel(%arg0: i32, %arg1: memref<1x8x128xf32, #tpu.memory_space<vmem>>, %arg2: memref<128x512xf32, #tpu.memory_space<vmem>>, %arg3: memref<1x128x128xf32, #tpu.memory_space<vmem>>, %arg4: memref<1x4x8x128xf32, #tpu.memory_space<vmem>>) attributes {dimension_semantics = [#tpu.dimension_semantics<parallel>], iteration_bounds = array<i64: 2>, scalar_prefetch = 0 : i64, scratch_operands = 0 : i64, tpu.core_type = #tpu.core_type<tc>, window_params = [{transform_indices = @transform_0, window_bounds = array<i64: 1, 8, 128>}, {pipeline_mode = #tpu.pipeline_mode<synchronous>, transform_indices = @transform_1, window_bounds = array<i64: 128, 512>}, {transform_indices = @transform_2, window_bounds = array<i64: 1, 128, 128>}, {transform_indices = @transform_3, window_bounds = array<i64: 1, 4, 8, 128>}]} {
    %c0 = arith.constant 0 : index
    %c0_0 = arith.constant 0 : index
    %c0_1 = arith.constant 0 : index
    %0 = vector.load %arg1[%c0, %c0_0, %c0_1] : memref<1x8x128xf32, #tpu.memory_space<vmem>>, vector<1x8x128xf32>
    %1 = vector.shape_cast %0 : vector<1x8x128xf32> to vector<8x128xf32>
    %c0_2 = arith.constant 0 : index
    %c0_3 = arith.constant 0 : index
    %c0_4 = arith.constant 0 : index
    %2 = vector.load %arg3[%c0_2, %c0_3, %c0_4] : memref<1x128x128xf32, #tpu.memory_space<vmem>>, vector<1x128x128xf32>
    %3 = vector.shape_cast %2 : vector<1x128x128xf32> to vector<128x128xf32>
    %c0_5 = arith.constant 0 : index
    %c0_6 = arith.constant 0 : index
    %4 = vector.load %arg2[%c0_5, %c0_6] : memref<128x512xf32, #tpu.memory_space<vmem>>, vector<128x512xf32>
    %cst = arith.constant dense<0.000000e+00> : vector<8x512xf32>
    %5 = tpu.matmul %1, %4, %cst {dimension_numbers = #tpu.dot_dimension_numbers<[1], [0], [0], [1], [0, 0, 1, 1], [], []>} : vector<8x128xf32>, vector<128x512xf32>, vector<8x512xf32> -> vector<8x512xf32>
    %6 = vector.extract_strided_slice %5 {offsets = [0, 0], sizes = [8, 128], strides = [1, 1]} : vector<8x512xf32> to vector<8x128xf32>
    %cst_7 = arith.constant dense<0.000000e+00> : vector<8x128xf32>
    %7 = tpu.matmul %6, %3, %cst_7 {dimension_numbers = #tpu.dot_dimension_numbers<[1], [0], [0], [1], [0, 0, 1, 1], [], []>} : vector<8x128xf32>, vector<128x128xf32>, vector<8x128xf32> -> vector<8x128xf32>
    %c0_8 = arith.constant 0 : index
    %c0_9 = arith.constant 0 : index
    %c0_10 = arith.constant 0 : index
    %c0_11 = arith.constant 0 : index
    %8 = vector.load %arg4[%c0_8, %c0_9, %c0_10, %c0_11] : memref<1x4x8x128xf32, #tpu.memory_space<vmem>>, vector<1x1x8x128xf32>
    %9 = vector.shape_cast %8 : vector<1x1x8x128xf32> to vector<8x128xf32>
    %10 = vector.shape_cast %7 : vector<8x128xf32> to vector<1x1x8x128xf32>
    tpu.vector_store %arg4[%c0_8, %c0_9, %c0_10, %c0_11], %10 {strides = array<i32>} : memref<1x4x8x128xf32, #tpu.memory_space<vmem>>, vector<1x1x8x128xf32>,
    %11 = vector.extract_strided_slice %5 {offsets = [0, 128], sizes = [8, 128], strides = [1, 1]} : vector<8x512xf32> to vector<8x128xf32>
    %cst_12 = arith.constant dense<0.000000e+00> : vector<8x128xf32>
    %12 = tpu.matmul %11, %3, %cst_12 {dimension_numbers = #tpu.dot_dimension_numbers<[1], [0], [0], [1], [0, 0, 1, 1], [], []>} : vector<8x128xf32>, vector<128x128xf32>, vector<8x128xf32> -> vector<8x128xf32>
    %c0_13 = arith.constant 0 : index
    %c1 = arith.constant 1 : index
    %c0_14 = arith.constant 0 : index
    %c0_15 = arith.constant 0 : index
    %13 = vector.load %arg4[%c0_13, %c1, %c0_14, %c0_15] : memref<1x4x8x128xf32, #tpu.memory_space<vmem>>, vector<1x1x8x128xf32>
    %14 = vector.shape_cast %13 : vector<1x1x8x128xf32> to vector<8x128xf32>
    %15 = vector.shape_cast %12 : vector<8x128xf32> to vector<1x1x8x128xf32>
    tpu.vector_store %arg4[%c0_13, %c1, %c0_14, %c0_15], %15 {strides = array<i32>} : memref<1x4x8x128xf32, #tpu.memory_space<vmem>>, vector<1x1x8x128xf32>,
    %16 = vector.extract_strided_slice %5 {offsets = [0, 256], sizes = [8, 128], strides = [1, 1]} : vector<8x512xf32> to vector<8x128xf32>
    %cst_16 = arith.constant dense<0.000000e+00> : vector<8x128xf32>
    %17 = tpu.matmul %16, %3, %cst_16 {dimension_numbers = #tpu.dot_dimension_numbers<[1], [0], [0], [1], [0, 0, 1, 1], [], []>} : vector<8x128xf32>, vector<128x128xf32>, vector<8x128xf32> -> vector<8x128xf32>
    %c0_17 = arith.constant 0 : index
    %c2 = arith.constant 2 : index
    %c0_18 = arith.constant 0 : index
    %c0_19 = arith.constant 0 : index
    %18 = vector.load %arg4[%c0_17, %c2, %c0_18, %c0_19] : memref<1x4x8x128xf32, #tpu.memory_space<vmem>>, vector<1x1x8x128xf32>
    %19 = vector.shape_cast %18 : vector<1x1x8x128xf32> to vector<8x128xf32>
    %20 = vector.shape_cast %17 : vector<8x128xf32> to vector<1x1x8x128xf32>
    tpu.vector_store %arg4[%c0_17, %c2, %c0_18, %c0_19], %20 {strides = array<i32>} : memref<1x4x8x128xf32, #tpu.memory_space<vmem>>, vector<1x1x8x128xf32>,
    %21 = vector.extract_strided_slice %5 {offsets = [0, 384], sizes = [8, 128], strides = [1, 1]} : vector<8x512xf32> to vector<8x128xf32>
    %cst_20 = arith.constant dense<0.000000e+00> : vector<8x128xf32>
    %22 = tpu.matmul %21, %3, %cst_20 {dimension_numbers = #tpu.dot_dimension_numbers<[1], [0], [0], [1], [0, 0, 1, 1], [], []>} : vector<8x128xf32>, vector<128x128xf32>, vector<8x128xf32> -> vector<8x128xf32>
    %c0_21 = arith.constant 0 : index
    %c3 = arith.constant 3 : index
    %c0_22 = arith.constant 0 : index
    %c0_23 = arith.constant 0 : index
    %23 = vector.load %arg4[%c0_21, %c3, %c0_22, %c0_23] : memref<1x4x8x128xf32, #tpu.memory_space<vmem>>, vector<1x1x8x128xf32>
    %24 = vector.shape_cast %23 : vector<1x1x8x128xf32> to vector<8x128xf32>
    %25 = vector.shape_cast %22 : vector<8x128xf32> to vector<1x1x8x128xf32>
    tpu.vector_store %arg4[%c0_21, %c3, %c0_22, %c0_23], %25 {strides = array<i32>} : memref<1x4x8x128xf32, #tpu.memory_space<vmem>>, vector<1x1x8x128xf32>,
    return
  }
  func.func @transform_0(%arg0: i32) -> (i32, i32, i32) {
    %c0_i32 = arith.constant 0 : i32
    %c0_i32_0 = arith.constant 0 : i32
    %c0_i32_1 = arith.constant 0 : i32
    return %arg0, %c0_i32, %c0_i32_0 : i32, i32, i32
  }
  func.func @transform_1(%arg0: i32) -> (i32, i32) {
    %c0_i32 = arith.constant 0 : i32
    %c0_i32_0 = arith.constant 0 : i32
    %c0_i32_1 = arith.constant 0 : i32
    return %c0_i32, %c0_i32_0 : i32, i32
  }
  func.func @transform_2(%arg0: i32) -> (i32, i32, i32) {
    %c0_i32 = arith.constant 0 : i32
    %c0_i32_0 = arith.constant 0 : i32
    %c0_i32_1 = arith.constant 0 : i32
    return %arg0, %c0_i32, %c0_i32_0 : i32, i32, i32
  }
  func.func @transform_3(%arg0: i32) -> (i32, i32, i32, i32) {
    %c0_i32 = arith.constant 0 : i32
    %c0_i32_0 = arith.constant 0 : i32
    %c0_i32_1 = arith.constant 0 : i32
    %c0_i32_2 = arith.constant 0 : i32
    return %arg0, %c0_i32, %c0_i32_0, %c0_i32_1 : i32, i32, i32, i32
  }
}

</mosaic_0001>

<bundles_post_ra>
// kernel: tpu_custom_call.1
= control target key start
LH: loop header
LB: loop body
LE: loop exit
PB: predicated region body
PF: predicated region fallthrough
CT: control target
= control target key end

     0   :  { %8 = vsyncpa [#allocation3], 0  ;;  %s1855_s0 = inlined_call_operand.hbm [shape: f32[2,8,128], index: 0, kind: input, shape index: {}]   ;;  %s1856_s1 = inlined_call_operand.hbm [shape: f32[128,512], index: 1, kind: input, shape index: {}]   ;;  %s1857_s2 = inlined_call_operand.hbm [shape: f32[2,128,128], index: 2, kind: input, shape index: {}]   ;;  %s1858_s3 = inlined_call_operand.hbm [shape: f32[2,4,8,128], index: 3, kind: output, shape index: {}]  }
   0x1   :  { %10 = vsyncpa [#allocation3 + $0x1], 0 }
   0x2   :  { %11 = vsyncpa [#allocation6], 0 }
   0x3   :  { %12 = vsyncpa [#allocation4], 0 }
   0x4   :  { %14 = vsyncpa [#allocation4 + $0x1], 0  ;;  %s1525_s12 = smov 0   ;;  %s1527_s13 = smov 0  }
   0x5   :  { %s1529_s14 = smov 0   ;;  %s1531_s15 = smov 0  }
   0x6 LB: > { %s1546_s16 = sadd.s32 1, %s1490_s15   ;;  %s27_s17 = sadd.s32 1, %s1486_s14  ;;  %s1490_s15 = sphi %s1531_s15, %s1879_s15   ;;  %s1486_s14 = sphi %s1529_s14, %s1878_s14   ;;  %s1482_s13 = sphi %s1527_s13, %s1877_s13   ;;  %s1478_s12 = sphi %s1525_s12, %s1876_s12  }
   0x7   : > { %s24_s18 = ssub.s32 %s1490_s15, %s1546_s16  ;;  %p34_p0 = scmp.ne.s32.totalorder %s1486_s14, %s1482_s13 }
   0x8   : > { %p25_p1 = scmp.eq.s32.totalorder %s24_s18, 0  ;;  %p35_p2 = scmp.eq.s32.totalorder %s1490_s15, 0 }
   0x9   : > { %p1283_p4 = scmp.lt.s32.totalorder %s1490_s15, 2  ;;  %s150_s20 = sand.u32 1, %s1490_s15  }
   0xa   : > { %s1557_s19 = scalar_select %p25_p1, %s1486_s14, %s27_s17  }
   0xb   : > { %p36_p5 = por %p35_p2, %p34_p0  ;;  %s152_s21 = sand.u32 1, %s1486_s14  }
   0xc   : > { %s869_s22 = sshll.u32 %s152_s21, 3  ;;  %s870_s23 = sshll.u32 %s1490_s15, 7 }
   0xd   : > { %s1568_s26 = scalar_lea.hbm %s1855_s0, %s870_s23  ;;  %s154_s27 = scalar_lea.vmem [#allocation2], %s869_s22 }
   0xe   : > { %s161_s28 = sshll.u32 %s154_s27, 4  ;;  %p1570_p6 = pnand %p1283_p4, %p36_p5  ;;  %s1574_s28 = int_to_ptr.vmem [resolvable:$true] %s161_s28 }
   0xf   : > { %s1576_s30 = sshll.u32 %s152_s21, 7  ;;  %s1578_s4 = scalar_lea.sflag [#allocation3], %s150_s20 }
  0x10   : > { %s1328_s5 = scalar_lea.hbm %s1568_s26, 128  ;;  %p1330_p8 = pneg %p1570_p6 }
  0x11   : > { %p1329_p7 = scmp.ne.s32.totalorder %s1568_s26, %s1328_s5  ;;  %s1333_s8 = scalar_lea.hbm %s1855_s0, 256 }
  0x12   : > { %p1334_p11 = scmp.lt.u32.totalorder %s1568_s26, %s1855_s0  ;;  %p1335_p12 = scmp.lt.u32.totalorder %s1333_s8, %s1328_s5 }
  0x13   : > { %p1331_p9 = pnand %p1330_p8, %p1329_p7  ;;  %p1337_p1 = scmp.lt.u32.totalorder %s1328_s5, %s1568_s26 }
  0x14   : > { %p1336_p13 = por %p1335_p12, %p1334_p11 }
  0x15   : > { %p1332_p10 = pneg %p1331_p9 }
  0x16   : > { %p1338_p2 = por %p1337_p1, %p1336_p13 }
  0x18   : > { %p1339_p4 = pnand %p1338_p2, %p1332_p10 }
  0x1a   : > { %1342 = shalt.err (!%p1339_p4)
}
  0x1b   : > { %s1343_s11 = scalar_lea.vmem %s1574_s28, 128  ;;  %s1492_s17 = smov [#allocation2]  }
  0x1c   : > { %p1344_p5 = scmp.ne.s32.totalorder %s1574_s28, %s1343_s11  ;;  %s1348_s18 = sshll.u32 %s1492_s17, 4  ;;  %s1349_s18 = int_to_ptr.vmem [resolvable:$false] %s1348_s18 }
  0x1d   : > { %s1350_s20 = scalar_lea.vmem %s1349_s18, 256  ;;  %p1351_p3 = scmp.lt.s32.totalorder %s1574_s28, %s1349_s18 }
  0x1e   : > { %p1346_p7 = pnand %p1344_p5, %p1330_p8  ;;  %p1352_p11 = scmp.lt.s32.totalorder %s1350_s20, %s1343_s11 }
  0x20   : > { %p1347_p9 = pneg %p1346_p7  ;;  %p1353_p12 = por %p1352_p11, %p1351_p3 }
  0x22   : > { %p1354_p13 = pnand %p1353_p12, %p1347_p9 }
  0x24   : > { %1357 = shalt.err (!%p1354_p13)
}
  0x25   : > { %1274 = dma.hbm_to_vmem [thread:$0]  (!%p1570_p6), %s1568_s26, 128, %s1574_s28, %s1578_s4  }
  0x26   : > { %s172_s21 = scalar_lea.vmem [#allocation7], %s1576_s30  ;;  %s1610_s23 = sadd.s32 4294967295, %s1490_s15  }
  0x27   : > { %s179_s22 = sshll.u32 %s172_s21, 4  ;;  %s865_s24 = sadd.s32 4294967294, %s1490_s15   ;;  %s1607_s22 = int_to_ptr.vmem [resolvable:$true] %s179_s22 }
  0x28   : > { %p40_p3 = scmp.ne.s32.totalorder %s1482_s13, %s1478_s12  ;;  %p1859_p10 = scmp.eq.s32.totalorder %s1610_s23, 0 }
  0x29   : > { %p111_p1 = scmp.eq.s32.totalorder %s1610_s23, 1  ;;  %p117_p2 = scmp.eq.s32.totalorder %s865_s24, 1 }
  0x2a   : > { %p1619_p4 = por %p1859_p10, %p40_p3  ;;  %p866_p5 = scmp.ge.s32.totalorder %s1490_s15, 1 }
  0x2b   : > { %p1627_p7 = por %p111_p1, %p34_p0  ;;  %p1631_p9 = por %p117_p2, %p40_p3 }
  0x2c   : > { %s1864_s25 = scalar_select %p1619_p4, 1, 0 }
  0x2d   : > { %s1865_s26 = scalar_select %p1627_p7, 1, 0 }
  0x2e   : > { %s1866_s27 = scalar_select %p1631_p9, 1, 0 }
  0x2f   : > { %p124_p11 = scmp.lt.s32.totalorder %s1490_s15, 3  ;;  %s1493_s30 = smov [#allocation5]  }
  0x30   : > { %s136_s5 = sshll.u32 %s1493_s30, 4  ;;  %s887_s6 = sshll.u32 %s1490_s15, 11  ;;  %s1640_s5 = int_to_ptr.vmem [resolvable:$true] %s136_s5 }
  0x31   : > { %p1636_p12 = pnand %p866_p5, %p124_p11  ;;  %s1648_s9 = scalar_lea.hbm %s1857_s2, %s887_s6 }
  0x32   : > { %s1358_s11 = scalar_lea.hbm %s1648_s9, 2048  ;;  %s1363_s20 = scalar_lea.hbm %s1857_s2, 4096 }
  0x33   : > { %s1867_s28 = scalar_select %p1636_p12, 1, 0 }
  0x34   : > { %p1267_p13 = pneg %p1636_p12  ;;  %p1359_p3 = scmp.ne.s32.totalorder %s1648_s9, %s1358_s11 }
  0x35   : > { %p1364_p5 = scmp.lt.u32.totalorder %s1648_s9, %s1857_s2  ;;  %p1365_p11 = scmp.lt.u32.totalorder %s1363_s20, %s1358_s11 }
  0x36   : > { %p1652_p0 = pnand %p1267_p13, %p1859_p10  ;;  %p1361_p1 = pnand %p1359_p3, %p1330_p8 }
  0x37   : > { %p1366_p9 = por %p1365_p11, %p1364_p5  ;;  %p1367_p13 = scmp.lt.u32.totalorder %s1358_s11, %s1648_s9 }
  0x38   : > { %p1362_p2 = pneg %p1361_p1 }
  0x39   : > { %p1368_p10 = por %p1367_p13, %p1366_p9 }
  0x3b   : > { %p1369_p7 = pnand %p1368_p10, %p1362_p2 }
  0x3d   : > { %1372 = shalt.err (!%p1369_p7)
}
  0x3e   : > { %s1373_s30 = scalar_lea.vmem %s1607_s22, 2048  ;;  %s1494_s6 = smov [#allocation7]  }
  0x3f   : > { %p1374_p3 = scmp.ne.s32.totalorder %s1607_s22, %s1373_s30  ;;  %s1378_s7 = sshll.u32 %s1494_s6, 4  ;;  %s1379_s7 = int_to_ptr.vmem [resolvable:$false] %s1378_s7 }
  0x40   : > { %s1380_s8 = scalar_lea.vmem %s1379_s7, 4096  ;;  %p1381_p12 = scmp.lt.s32.totalorder %s1607_s22, %s1379_s7 }
  0x41   : > { %p1376_p1 = pnand %p1374_p3, %p1330_p8  ;;  %p1382_p5 = scmp.lt.s32.totalorder %s1380_s8, %s1373_s30 }
  0x43   : > { %p1377_p4 = pneg %p1376_p1  ;;  %p1383_p11 = por %p1382_p5, %p1381_p12 }
  0x45   : > { %p1384_p9 = pnand %p1383_p11, %p1377_p4 }
  0x47   : > { %1387 = shalt.err (!%p1384_p9)
}
  0x48   : > { %s1495_s11 = smov 128   ;;  %s1496_s17 = smov 8  }
  0x49   : > { %1277 = dma.hbm_to_vmem [thread:$0]  (!%p1570_p6), %s1648_s9, 2048, %s1607_s22, %s1578_s4, %s1495_s11, %s1495_s11, %s1496_s17  }
  0x4a   : > { %s1388_s21 = scalar_lea.hbm %s1856_s1, 8192  ;;  %p1390_p10 = pneg %p1652_p0 }
  0x4b   : > { %p1389_p8 = scmp.ne.s32.totalorder %s1856_s1, %s1388_s21  ;;  %p1395_p12 = scmp.lt.u32.totalorder %s1388_s21, %s1856_s1 }
  0x4d   : > { %p1391_p4 = pnand %p1390_p10, %p1389_p8 }
  0x4f   : > { %p1392_p7 = pneg %p1391_p4 }
  0x51   : > { %p1397_p2 = pnand %p1395_p12, %p1392_p7 }
  0x53   : > { %1400 = shalt.err (!%p1397_p2)
}
  0x54   : > { %s1401_s29 = scalar_lea.vmem %s1640_s5, 8192  ;;  %p1409_p1 = scmp.lt.s32.totalorder %s1640_s5, %s1640_s5 }
  0x55   : > { %p1402_p6 = scmp.ne.s32.totalorder %s1640_s5, %s1401_s29  ;;  %p1410_p5 = scmp.lt.s32.totalorder %s1401_s29, %s1401_s29 }
  0x57   : > { %p1404_p13 = pnand %p1402_p6, %p1390_p10  ;;  %p1411_p11 = por %p1410_p5, %p1409_p1 }
  0x59   : > { %p1405_p3 = pneg %p1404_p13 }
  0x5b   : > { %p1412_p9 = pnand %p1411_p11, %p1405_p3 }
  0x5d   : > { %1415 = shalt.err (!%p1412_p9)
}
  0x5e   : > { %s1497_s4 = smov 512   ;;  %s1498_s22 = smov 32  }
  0x5f   : > { %1270 = dma.hbm_to_vmem [thread:$0]  (!%p1652_p0), %s1856_s1, 8192, %s1640_s5, [#allocation6], %s1497_s4, %s1497_s4, %s1498_s22  }
  0x60   : > { %p1869_p8 = scmp.ne.s32.totalorder %s1867_s28, 0 }
  0x61   : > { %s193_s11 = sand.u32 (!%p1869_p8), 1, %s1610_s23   ;;  %s1705_s17 = sand.u32 (!%p1869_p8), 1, %s1482_s13  }
  0x62   : > { %191 = sbr.rel (%p1869_p8) target bundleno = 620 (0x26c), region = 32  ;;  %s875_s18 = sshll.u32 (!%p1869_p8), %s1705_s17, 3 }
  0x63   : > { %s194_s20 = scalar_lea.sflag (!%p1869_p8), [#allocation3], %s193_s11  ;;  %s1708_s21 = scalar_lea.vmem (!%p1869_p8), [#allocation2], %s875_s18 }
  0x64   : > { %p1870_p10 = scmp.ne.s32.totalorder (!%p1869_p8), %s1864_s25, 0 }
  0x69   : > { %1461 = dma.done.wait (%p1870_p10), %s194_s20, 128  }
  0x6a   : > { %1463 = vsyncadd (%p1870_p10), %s194_s20, 4294967168  ;;  %p1871_p0 = scmp.eq.s32.totalorder %s1610_s23, 0 }
  0x6c   : > { %1465 = dma.done.wait (%p1871_p0), [#allocation6], 8192   ;;  %p1872_p4 = pmov %p1871_p0 }
  0x6d   : > { %s877_s28 = sshll.u32 %s1705_s17, 7 }
  0x6e   : > { %1467 = vsyncadd (%p1872_p4), [#allocation6], 4294959104  ;;  %s1719_s5 = scalar_lea.vmem [#allocation7], %s877_s28 }
  0x6f   : > { %1469 = dma.done.wait (%p1870_p10), %s194_s20, 2048  }
  0x70   : > { %1471 = vsyncadd (%p1870_p10), %s194_s20, 4294965248  ;;  %v1499_v0 = vmov 0.0   ;;  %v256_v1 = vld [vmem:[#allocation5 + $0x8] sm:$0xff]  ;;  %v255_v3 = vld [vmem:[#allocation5] sm:$0xff]  ;;  %vm1501_vm0 = vmmov 0   ;;  %s878_s25 = sshll.u32 %s1705_s17, 5 }
  0x71   : > { %383 = vmatprep.mubr.f32.mxu0 %v1499_v0  ;;  %454 = vmatprep.mubr.f32.mxu1 %v1499_v0  ;;  %v260_v2 = vld [vmem:[#allocation5 + $0x28] sm:$0xff]  ;;  %v259_v5 = vld [vmem:[#allocation5 + $0x20] sm:$0xff]  ;;  %v258_v26 = vld [vmem:[#allocation5 + $0x18] sm:$0xff]  ;;  %s237_s10 = scalar_lea.vmem [#allocation8], %s878_s25  ;;  %s888_s6 = sshll.u32 %s1610_s23, 9 }
  0x72   : > { %v1097_v4 = vpack.c.bf16 %v260_v2, %v256_v1  ;;  %v264_v6 = vld [vmem:[#allocation5 + $0x48] sm:$0xff]  ;;  %v1099_v8 = vpack.c.bf16 %v259_v5, %v255_v3  ;;  %v263_v10 = vld [vmem:[#allocation5 + $0x40] sm:$0xff]  ;;  %v262_v28 = vld [vmem:[#allocation5 + $0x38] sm:$0xff]  ;;  %s762_s24 = sshll.u32 %s237_s10, 4  ;;  %s1811_s29 = scalar_lea.hbm %s1858_s3, %s888_s6  ;;  %s1806_s24 = int_to_ptr.vmem [resolvable:$true] %s762_s24 }
  0x73   : > { %v268_v7 = vld [vmem:[#allocation5 + $0x68] sm:$0xff]  ;;  %v267_v11 = vld [vmem:[#allocation5 + $0x60] sm:$0xff]  ;;  %v257_v29 = vld [vmem:[#allocation5 + $0x10] sm:$0xff]  ;;  %v1129_v33 = vpack.c.bf16 %v262_v28, %v258_v26  ;;  %s749_s4 = scalar_lea.sflag [#allocation4], %s1705_s17  ;;  %s1416_s22 = scalar_lea.vmem %s1806_s24, 512 }
  0x74   : > { %v1101_v9 = vpack.c.bf16 %v268_v7, %v264_v6  ;;  %v272_v12 = vld [vmem:[#allocation5 + $0x88] sm:$0xff]  ;;  %1098 = vmatprep.subr.bf16.mxu0 %v1097_v4  ;;  %v1103_v14 = vpack.c.bf16 %v267_v11, %v263_v10  ;;  %v271_v16 = vld [vmem:[#allocation5 + $0x80] sm:$0xff]  ;;  %v261_v30 = vld [vmem:[#allocation5 + $0x30] sm:$0xff]  ;;  %p1417_p7 = scmp.ne.s32.totalorder %s1806_s24, %s1416_s22  ;;  %p1873_p12 = scmp.ne.s32.totalorder %s1865_s26, 0 }
  0x75   : > { %v276_v13 = vld [vmem:[#allocation5 + $0xa8] sm:$0xff]  ;;  %1100 = vmatpush1.bf16.msra.mxu0 %v1099_v8  ;;  %v275_v17 = vld [vmem:[#allocation5 + $0xa0] sm:$0xff]  ;;  %v1131_v34 = vpack.c.bf16 %v261_v30, %v257_v29  ;;  %v266_v35 = vld [vmem:[#allocation5 + $0x58] sm:$0xff]  ;;  %1130 = vmatprep.subr.bf16.mxu1 %v1129_v33  ;;  %v1500_v33 = vmov 0.0|0.0   ;;  %s1502_s23 = smov [#allocation8]  }
  0x76   : > { %1102 = vmatprep.subr.bf16.mxu0 %v1101_v9  ;;  %v1105_v15 = vpack.c.bf16 %v276_v13, %v272_v12  ;;  %v280_v18 = vld [vmem:[#allocation5 + $0xc8] sm:$0xff]  ;;  %v1107_v20 = vpack.c.bf16 %v275_v17, %v271_v16  ;;  %v279_v22 = vld [vmem:[#allocation5 + $0xc0] sm:$0xff]  ;;  %v270_v36 = vld [vmem:[#allocation5 + $0x78] sm:$0xff]  ;;  %p1418_p2 = pnand %p1417_p7, %p1873_p12  ;;  %s1420_s9 = sshll.u32 %s1502_s23, 4  ;;  %s1421_s9 = int_to_ptr.vmem [resolvable:$false] %s1420_s9 }
  0x77   : > { %v284_v19 = vld [vmem:[#allocation5 + $0xe8] sm:$0xff]  ;;  %v283_v23 = vld [vmem:[#allocation5 + $0xe0] sm:$0xff]  ;;  %v1133_v38 = vpack.c.bf16 %v270_v36, %v266_v35  ;;  %v265_v39 = vld [vmem:[#allocation5 + $0x50] sm:$0xff]  ;;  %1132 = vmatpush1.bf16.msra.mxu1 %v1131_v34  ;;  %s1422_s8 = scalar_lea.vmem %s1421_s9, 1024  ;;  %p1423_p13 = scmp.lt.s32.totalorder %s1806_s24, %s1421_s9 }
  0x78   : > { %v1109_v21 = vpack.c.bf16 %v284_v19, %v280_v18  ;;  %v288_v24 = vld [vmem:[#allocation5 + $0x108] sm:$0xff]  ;;  %v287_v27 = vld [vmem:[#allocation5 + $0x100] sm:$0xff]  ;;  %v1111_v31 = vpack.c.bf16 %v283_v23, %v279_v22  ;;  %v269_v40 = vld [vmem:[#allocation5 + $0x70] sm:$0xff]  ;;  %p1419_p6 = pneg %p1418_p2  ;;  %p1424_p3 = scmp.lt.s32.totalorder %s1422_s8, %s1416_s22 }
  0x79   : > { %1104 = vmatpush1.bf16.msra.mxu0 %v1103_v14  ;;  %v292_v25 = vld [vmem:[#allocation5 + $0x128] sm:$0xff]  ;;  %v291_v32 = vld [vmem:[#allocation5 + $0x120] sm:$0xff]  ;;  %v274_v41 = vld [vmem:[#allocation5 + $0x98] sm:$0xff]  ;;  %v1135_v45 = vpack.c.bf16 %v269_v40, %v265_v39  ;;  %1134 = vmatprep.subr.bf16.mxu1 %v1133_v38 }
  0x7a   : > { %1106 = vmatprep.subr.bf16.mxu0 %v1105_v15  ;;  %v1113_v37 = vpack.c.bf16 %v292_v25, %v288_v24  ;;  %v296_v42 = vld [vmem:[#allocation5 + $0x148] sm:$0xff]  ;;  %v278_v44 = vld [vmem:[#allocation5 + $0xb8] sm:$0xff]  ;;  %v1115_v46 = vpack.c.bf16 %v291_v32, %v287_v27  ;;  %v295_v47 = vld [vmem:[#allocation5 + $0x140] sm:$0xff]  ;;  %p1425_p1 = por %p1424_p3, %p1423_p13 }
  0x7b   : > { %v300_v43 = vld [vmem:[#allocation5 + $0x168] sm:$0xff]  ;;  %v1137_v48 = vpack.c.bf16 %v278_v44, %v274_v41  ;;  %v273_v49 = vld [vmem:[#allocation5 + $0x90] sm:$0xff]  ;;  %v299_v52 = vld [vmem:[#allocation5 + $0x160] sm:$0xff]  ;;  %1136 = vmatpush1.bf16.msra.mxu1 %v1135_v45 }
  0x7c   : > { %v277_v50 = vld [vmem:[#allocation5 + $0xb0] sm:$0xff]  ;;  %v1117_v51 = vpack.c.bf16 %v300_v43, %v296_v42  ;;  %v282_v53 = vld [vmem:[#allocation5 + $0xd8] sm:$0xff]  ;;  %v304_v55 = vld [vmem:[#allocation5 + $0x188] sm:$0xff]  ;;  %v1119_v58 = vpack.c.bf16 %v299_v52, %v295_v47  ;;  %p1426_p5 = pnand %p1425_p1, %p1419_p6 }
  0x7d   : > { %1108 = vmatpush1.bf16.msra.mxu0 %v1107_v20  ;;  %v286_v54 = vld [vmem:[#allocation5 + $0xf8] sm:$0xff]  ;;  %v308_v56 = vld [vmem:[#allocation5 + $0x1a8] sm:$0xff]  ;;  %v1139_v57 = vpack.c.bf16 %v277_v50, %v273_v49  ;;  %v303_v59 = vld [vmem:[#allocation5 + $0x180] sm:$0xff]  ;;  %1138 = vmatprep.subr.bf16.mxu1 %v1137_v48 }
  0x7e   : > { %1110 = vmatprep.subr.bf16.mxu0 %v1109_v21  ;;  %v1141_v60 = vpack.c.bf16 %v286_v54, %v282_v53  ;;  %v281_v61 = vld [vmem:[#allocation5 + $0xd0] sm:$0xff]  ;;  %v1121_v63 = vpack.c.bf16 %v308_v56, %v304_v55  ;;  %v307_v1 = vld [vmem:[#allocation5 + $0x1a0] sm:$0xff]  ;;  %v290_v2 = vld [vmem:[#allocation5 + $0x118] sm:$0xff] }
  0x7f   : > { %v285_v62 = vld [vmem:[#allocation5 + $0xf0] sm:$0xff]  ;;  %v294_v3 = vld [vmem:[#allocation5 + $0x138] sm:$0xff]  ;;  %v312_v4 = vld [vmem:[#allocation5 + $0x1c8] sm:$0xff]  ;;  %1140 = vmatpush1.bf16.msra.mxu1 %v1139_v57  ;;  %v1123_v7 = vpack.c.bf16 %v307_v1, %v303_v59 }
  0x80   : > { %v316_v5 = vld [vmem:[#allocation5 + $0x1e8] sm:$0xff]  ;;  %v1143_v6 = vpack.c.bf16 %v285_v62, %v281_v61  ;;  %v311_v8 = vld [vmem:[#allocation5 + $0x1c0] sm:$0xff]  ;;  %1142 = vmatprep.subr.bf16.mxu1 %v1141_v60  ;;  %v1145_v9 = vpack.c.bf16 %v294_v3, %v290_v2  ;;  %v289_v10 = vld [vmem:[#allocation5 + $0x110] sm:$0xff] }
  0x81   : > { %1112 = vmatpush1.bf16.msra.mxu0 %v1111_v31  ;;  %v293_v11 = vld [vmem:[#allocation5 + $0x130] sm:$0xff]  ;;  %v1125_v12 = vpack.c.bf16 %v316_v5, %v312_v4  ;;  %v315_v13 = vld [vmem:[#allocation5 + $0x1e0] sm:$0xff]  ;;  %v298_v14 = vld [vmem:[#allocation5 + $0x158] sm:$0xff] }
  0x82   : > { %1114 = vmatprep.subr.bf16.mxu0 %v1113_v37  ;;  %v302_v15 = vld [vmem:[#allocation5 + $0x178] sm:$0xff]  ;;  %v1147_v16 = vpack.c.bf16 %v293_v11, %v289_v10  ;;  %v1127_v17 = vpack.c.bf16 %v315_v13, %v311_v8  ;;  %v297_v19 = vld [vmem:[#allocation5 + $0x150] sm:$0xff]  ;;  %v239_v23 = vld [vmem:[%s1719_s5] sm:$0xff] }
  0x83   : > { %1144 = vmatpush1.bf16.msra.mxu1 %v1143_v6  ;;  %v1149_v18 = vpack.c.bf16 %v302_v15, %v298_v14  ;;  %v301_v20 = vld [vmem:[#allocation5 + $0x170] sm:$0xff]  ;;  %v306_v21 = vld [vmem:[#allocation5 + $0x198] sm:$0xff]  ;;  %v240_v24 = vld [vmem:[%s1719_s5 + $0x8] sm:$0xff] }
  0x84   : > { %1146 = vmatprep.subr.bf16.mxu1 %v1145_v9  ;;  %v310_v22 = vld [vmem:[#allocation5 + $0x1b8] sm:$0xff]  ;;  %v1151_v26 = vpack.c.bf16 %v301_v20, %v297_v19  ;;  %v305_v28 = vld [vmem:[#allocation5 + $0x190] sm:$0xff]  ;;  %v1730_v31 = vpack.c.bf16 %v240_v24, %v239_v23  ;;  %v243_v41 = vld [vmem:[%s1719_s5 + $0x20] sm:$0xff] }
  0x85   : > { %1116 = vmatpush1.bf16.msra.mxu0 %v1115_v46  ;;  %v238_v25 = vld [vmem:[%s1708_s21] sm:$0xff]  ;;  %v1153_v27 = vpack.c.bf16 %v310_v22, %v306_v21  ;;  %v244_v42 = vld [vmem:[%s1719_s5 + $0x28] sm:$0xff]  ;;  %v247_v48 = vld [vmem:[%s1719_s5 + $0x40] sm:$0xff] }
  0x86   : > { %1118 = vmatprep.subr.bf16.mxu0 %v1117_v51  ;;  %v309_v29 = vld [vmem:[#allocation5 + $0x1b0] sm:$0xff]  ;;  %v314_v30 = vld [vmem:[#allocation5 + $0x1d8] sm:$0xff]  ;;  %v1742_v44 = vpack.c.bf16 %v244_v42, %v243_v41  ;;  %v248_v49 = vld [vmem:[%s1719_s5 + $0x48] sm:$0xff] }
  0x87   : > { %1148 = vmatpush1.bf16.msra.mxu1 %v1147_v16  ;;  %v318_v32 = vld [vmem:[#allocation5 + $0x1f8] sm:$0xff]  ;;  %v241_v34 = vld [vmem:[%s1719_s5 + $0x10] sm:$0xff]  ;;  %v1155_v36 = vpack.c.bf16 %v309_v29, %v305_v28  ;;  %v1174_v50 = vpack.c.bf16 %v248_v49, %v247_v48  ;;  %v251_v54 = vld [vmem:[%s1719_s5 + $0x60] sm:$0xff] }
  0x88   : > { %1150 = vmatprep.subr.bf16.mxu1 %v1149_v18  ;;  %v242_v35 = vld [vmem:[%s1719_s5 + $0x18] sm:$0xff]  ;;  %v1157_v37 = vpack.c.bf16 %v318_v32, %v314_v30  ;;  %v313_v38 = vld [vmem:[#allocation5 + $0x1d0] sm:$0xff]  ;;  %v252_v55 = vld [vmem:[%s1719_s5 + $0x68] sm:$0xff] }
  0x89   : > { %1120 = vmatpush1.bf16.msra.mxu0 %v1119_v58  ;;  %v317_v39 = vld [vmem:[#allocation5 + $0x1f0] sm:$0xff]  ;;  %v1736_v40 = vpack.c.bf16 %v242_v35, %v241_v34  ;;  %v246_v46 = vld [vmem:[%s1719_s5 + $0x38] sm:$0xff]  ;;  %v1180_v56 = vpack.c.bf16 %v252_v55, %v251_v54 }
  0x8a   : > { %1122 = vmatprep.subr.bf16.mxu0 %v1121_v63  ;;  %v1159_v43 = vpack.c.bf16 %v317_v39, %v313_v38  ;;  %v245_v45 = vld [vmem:[%s1719_s5 + $0x30] sm:$0xff]  ;;  %v250_v52 = vld [vmem:[%s1719_s5 + $0x58] sm:$0xff] }
  0x8b   : > { %1152 = vmatpush1.bf16.msra.mxu1 %v1151_v26  ;;  %v1749_v47 = vpack.c.bf16 %v246_v46, %v245_v45  ;;  %v249_v51 = vld [vmem:[%s1719_s5 + $0x50] sm:$0xff]  ;;  %v254_v58 = vld [vmem:[%s1719_s5 + $0x78] sm:$0xff] }
  0x8c   : > { %1154 = vmatprep.subr.bf16.mxu1 %v1153_v27  ;;  %v1177_v53 = vpack.c.bf16 %v250_v52, %v249_v51  ;;  %v253_v57 = vld [vmem:[%s1719_s5 + $0x70] sm:$0xff] }
  0x8d   : > { %1124 = vmatpush1.bf16.msra.mxu0 %v1123_v7  ;;  %v1183_v59 = vpack.c.bf16 %v254_v58, %v253_v57 }
  0x8e   : > { %1126 = vmatprep.subr.bf16.mxu0 %v1125_v12 }
  0x8f   : > { %1156 = vmatpush1.bf16.msra.mxu1 %v1155_v36 }
  0x90   : > { %1158 = vmatprep.subr.bf16.mxu1 %v1157_v37 }
  0x91   : > { %1128 = vmatpush1.bf16.msra.mxu0 %v1127_v17 }
  0x92   : > { %1161 = vmatprep.subr.bf16.mxu0 %v1500_v33 }
  0x93   : > { %1160 = vmatpush1.bf16.msra.mxu1 %v1159_v43 }
  0x94   : > { %384 = vmatmul.mubr.f32.vlgmr.msra.gmra.mrb[0].mxu0 %v238_v25  ;;  %1185 = vmatprep.subr.bf16.mxu1 %v1500_v33 }
  0x95   : > { %1163 = vmatpush3.bf16.msra.mxu0 %v1730_v31  ;;  %989 = vmatprep.mubr.msk.f32.mxu0 %vm1501_vm0, %v1499_v0 }
  0x96   : > { %1164 = vmatprep.subr.bf16.mxu0 %v1500_v33  ;;  %455 = vmatmul.mubr.f32.vlgmr.msra.gmra.mrb[0].mxu1 %v238_v25 }
  0x97   : > { %1187 = vmatpush3.bf16.msra.mxu1 %v1730_v31  ;;  %1024 = vmatprep.mubr.msk.f32.mxu1 %vm1501_vm0, %v1499_v0 }
  0x98   : > { %1188 = vmatprep.subr.bf16.mxu1 %v1500_v33 }
  0x99   : > { %1166 = vmatpush3.bf16.msra.mxu0 %v1736_v40 }
  0x9a   : > { %1167 = vmatprep.subr.bf16.mxu0 %v1500_v33 }
  0x9b   : > { %1190 = vmatpush3.bf16.msra.mxu1 %v1736_v40 }
  0x9c   : > { %1191 = vmatprep.subr.bf16.mxu1 %v1500_v33 }
  0x9d   : > { %1169 = vmatpush3.bf16.msra.mxu0 %v1742_v44 }
  0x9e   : > { %1170 = vmatprep.subr.bf16.mxu0 %v1500_v33 }
  0x9f   : > { %1193 = vmatpush3.bf16.msra.mxu1 %v1742_v44 }
  0xa0   : > { %1194 = vmatprep.subr.bf16.mxu1 %v1500_v33 }
  0xa1   : > { %1172 = vmatpush3.bf16.msra.mxu0 %v1749_v47 }
  0xa2   : > { %1173 = vmatprep.subr.bf16.mxu0 %v1500_v33 }
  0xa3   : > { %1196 = vmatpush3.bf16.msra.mxu1 %v1749_v47 }
  0xa4   : > { %1197 = vmatprep.subr.bf16.mxu1 %v1500_v33 }
  0xa5   : > { %1175 = vmatpush3.bf16.msra.mxu0 %v1174_v50 }
  0xa6   : > { %1176 = vmatprep.subr.bf16.mxu0 %v1500_v33 }
  0xa7   : > { %1199 = vmatpush3.bf16.msra.mxu1 %v1174_v50 }
  0xa8   : > { %1200 = vmatprep.subr.bf16.mxu1 %v1500_v33 }
  0xa9   : > { %1178 = vmatpush3.bf16.msra.mxu0 %v1177_v53 }
  0xaa   : > { %1179 = vmatprep.subr.bf16.mxu0 %v1500_v33 }
  0xab   : > { %1202 = vmatpush3.bf16.msra.mxu1 %v1177_v53 }
  0xac   : > { %1203 = vmatprep.subr.bf16.mxu1 %v1500_v33 }
  0xad   : > { %1181 = vmatpush3.bf16.msra.mxu0 %v1180_v56 }
  0xae   : > { %1182 = vmatprep.subr.bf16.mxu0 %v1500_v33 }
  0xaf   : > { %1205 = vmatpush3.bf16.msra.mxu1 %v1180_v56 }
  0xb0   : > { %1206 = vmatprep.subr.bf16.mxu1 %v1500_v33 }
  0xb1   : > { %1184 = vmatpush3.bf16.msra.mxu0 %v1183_v59 }
  0xb2   : > { %1209 = vmatprep.subr.bf16.mxu0 %v1500_v33 }
  0xb3   : > { %1208 = vmatpush3.bf16.msra.mxu1 %v1183_v59 }
  0xb4   : > { %1233 = vmatprep.subr.bf16.mxu1 %v1500_v33 }
 0x167   : > { %v385_v60 = vpop.f32.mrb[0].mxu0 }
 0x168   : > { %v387_v61 = vpop.f32.mrb[1].mxu0  ;;  %990 = vmatmul.mubr.f32.vlgmr.msra.gmra.mrb[2].mxu0 %v385_v60 }
 0x169   : > { %1211 = vmatpush3.bf16.msra.mxu0 %v1730_v31  ;;  %1025 = vmatmul.mubr.f32.vlgmr.msra.gmra.mrb[2].mxu1 %v387_v61  ;;  %v456_v62 = vpop.f32.mrb[0].mxu1 }
 0x16a   : > { %1235 = vmatpush3.bf16.msra.mxu1 %v1730_v31  ;;  %1212 = vmatprep.subr.bf16.mxu0 %v1500_v33  ;;  %v458_v63 = vpop.f32.mrb[1].mxu1 }
 0x16b   : > { %1236 = vmatprep.subr.bf16.mxu1 %v1500_v33  ;;  %1059 = vmatprep.mubr.msk.f32.mxu0 %vm1501_vm0, %v1499_v0 }
 0x16c   : > { %1094 = vmatprep.mubr.msk.f32.mxu1 %vm1501_vm0, %v1499_v0 }
 0x16d   : > { %1214 = vmatpush3.bf16.msra.mxu0 %v1736_v40 }
 0x16e   : > { %1238 = vmatpush3.bf16.msra.mxu1 %v1736_v40  ;;  %1215 = vmatprep.subr.bf16.mxu0 %v1500_v33 }
 0x16f   : > { %1239 = vmatprep.subr.bf16.mxu1 %v1500_v33 }
 0x171   : > { %1217 = vmatpush3.bf16.msra.mxu0 %v1742_v44 }
 0x172   : > { %1241 = vmatpush3.bf16.msra.mxu1 %v1742_v44  ;;  %1218 = vmatprep.subr.bf16.mxu0 %v1500_v33 }
 0x173   : > { %1242 = vmatprep.subr.bf16.mxu1 %v1500_v33 }
 0x175   : > { %1220 = vmatpush3.bf16.msra.mxu0 %v1749_v47 }
 0x176   : > { %1244 = vmatpush3.bf16.msra.mxu1 %v1749_v47  ;;  %1221 = vmatprep.subr.bf16.mxu0 %v1500_v33 }
 0x177   : > { %1245 = vmatprep.subr.bf16.mxu1 %v1500_v33 }
 0x179   : > { %1223 = vmatpush3.bf16.msra.mxu0 %v1174_v50 }
 0x17a   : > { %1247 = vmatpush3.bf16.msra.mxu1 %v1174_v50  ;;  %1224 = vmatprep.subr.bf16.mxu0 %v1500_v33 }
 0x17b   : > { %1248 = vmatprep.subr.bf16.mxu1 %v1500_v33 }
 0x17d   : > { %1226 = vmatpush3.bf16.msra.mxu0 %v1177_v53 }
 0x17e   : > { %1250 = vmatpush3.bf16.msra.mxu1 %v1177_v53  ;;  %1227 = vmatprep.subr.bf16.mxu0 %v1500_v33 }
 0x17f   : > { %1251 = vmatprep.subr.bf16.mxu1 %v1500_v33 }
 0x181   : > { %1229 = vmatpush3.bf16.msra.mxu0 %v1180_v56 }
 0x182   : > { %1253 = vmatpush3.bf16.msra.mxu1 %v1180_v56  ;;  %1230 = vmatprep.subr.bf16.mxu0 %v1500_v33 }
 0x183   : > { %1254 = vmatprep.subr.bf16.mxu1 %v1500_v33 }
 0x185   : > { %1232 = vmatpush3.bf16.msra.mxu0 %v1183_v59 }
 0x186   : > { %1256 = vmatpush3.bf16.msra.mxu1 %v1183_v59 }
 0x188   : > { %1060 = vmatmul.mubr.f32.vlgmr.msra.gmra.mrb[4].mxu0 %v456_v62 }
 0x189   : > { %1095 = vmatmul.mubr.f32.vlgmr.msra.gmra.mrb[4].mxu1 %v458_v63 }
 0x23b   : > { %v527_v0 = vpop.f32.mrb[2].mxu0 }
 0x23c   : > { %531 = vst [vmem:[%s237_s10] sm:$0xff] %v527_v0  ;;  %v991_v1 = vpop.f32.mrb[3].mxu0  ;;  %v598_v2 = vpop.f32.mrb[2].mxu1 }
 0x23d   : > { %879 = vst [vmem:[%s237_s10 + $0x8] sm:$0xff] %v598_v2  ;;  %v1026_v3 = vpop.f32.mrb[3].mxu1 }
 0x25b   : > { %v670_v4 = vpop.f32.mrb[4].mxu0 }
 0x25c   : > { %880 = vst [vmem:[%s237_s10 + $0x10] sm:$0xff] %v670_v4  ;;  %v1061_v5 = vpop.f32.mrb[5].mxu0  ;;  %v742_v6 = vpop.f32.mrb[4].mxu1 }
 0x25d   : > { %881 = vst [vmem:[%s237_s10 + $0x18] sm:$0xff] %v742_v6  ;;  %v1096_v7 = vpop.f32.mrb[5].mxu1 }
 0x25e   : > { %1429 = shalt.err (!%p1426_p5)
}
 0x25f   : > { %s1430_s11 = scalar_lea.hbm %s1811_s29, 512  ;;  %s1434_s21 = scalar_lea.hbm %s1858_s3, 1024 }
 0x260   : > { %p1431_p11 = scmp.ne.s32.totalorder %s1811_s29, %s1430_s11  ;;  %p1435_p10 = scmp.lt.u32.totalorder %s1811_s29, %s1858_s3 }
 0x261   : > { %p1436_p0 = scmp.lt.u32.totalorder %s1434_s21, %s1430_s11  ;;  %p1438_p7 = scmp.lt.u32.totalorder %s1430_s11, %s1811_s29 }
 0x262   : > { %p1432_p9 = pnand %p1431_p11, %p1873_p12 }
 0x263   : > { %p1437_p4 = por %p1436_p0, %p1435_p10 }
 0x264   : > { %p1433_p8 = pneg %p1432_p9 }
 0x265   : > { %p1439_p2 = por %p1438_p7, %p1437_p4 }
 0x267   : > { %p1440_p6 = pnand %p1439_p2, %p1433_p8 }
 0x269   : > { %1443 = shalt.err (!%p1440_p6)
}
 0x26a   : > { %s1503_s25 = smov 128   ;;  %s1504_s10 = smov 8  }
 0x26b   : > { %1265 = dma.vmem_to_hbm [thread:$0]  (%p1873_p12), %s1806_s24, 512, %s1811_s29, %s749_s4, %s1503_s25, %s1503_s25, %s1504_s10  }
 0x26c PF: > { %s777_s6 = sand.u32 1, %s1478_s12   ;;  %p1874_p13 = scmp.ne.s32.totalorder %s1866_s27, 0 }
 0x26d   : > { %p1875_p3 = scmp.ge.s32.totalorder %s1490_s15, 2  ;;  %s778_s30 = scalar_lea.sflag [#allocation4], %s777_s6 }
 0x26f   : > { %p1279_p1 = pnand %p1875_p3, %p1874_p13 }
 0x271   : > { %1473 = dma.done.wait (!%p1279_p1), %s778_s30, 512  }
 0x272   : > { %1475 = vsyncadd (!%p1279_p1), %s778_s30, 4294966784  ;;  %p17_p5 = scmp.ge.s32.totalorder %s1546_s16, 4   ;;  %s1876_s12 = smov %s1482_s13 }
 0x273   : > { %s1877_s13 = smov %s1486_s14  ;;  %s1878_s14 = smov %s1557_s19 }
 0x274   : > { %s1879_s15 = smov %s1546_s16  ;;  %19 = sbr.rel (!%p17_p5) target bundleno = 6 (0x6), region = 95 }
 0x27b   :  { %783 = vsyncpa [#allocation3], 1 }
 0x27c   :  { %785 = vsyncpa [#allocation3 + $0x1], 1 }
 0x27d   :  { %786 = vsyncpa [#allocation6], 1 }
 0x27e   :  { %787 = vsyncpa [#allocation4], 1 }
 0x27f   :  { %789 = vsyncpa [#allocation4 + $0x1], 1 }

</bundles_post_ra>
